<compile_context>
chip_gen: v6e
topology: v6e:2x2x1
jax: 0.10.0
libtpu: 0.0.40
codegen_flags: <defaults>
</compile_context>

<pallas_src>
import functools

import jax
import jax.numpy as jnp
from jax import lax
from jax.experimental import pallas as pl
from jax.experimental.pallas import tpu as pltpu


def _round_up(x, m):
    return -(-x // m) * m


def _tnmf_forward_kernel(w_ref, h_ref, v_ref, recon_ref, psum_ref, *, total_t):
    tb, tm, dk = w_ref.shape
    tn = recon_ref.shape[2]

    # One lane-dense MXU matmul for the whole (Tb, Tm) row block:
    #   (Tb*Tm, Dk) @ (Dk, Tn) -> (Tb*Tm, Tn), accumulated in f32.
    w2 = w_ref[...].reshape(tb * tm, dk)
    recon = jnp.dot(w2, h_ref[0], preferred_element_type=jnp.float32)
    recon_ref[...] = recon.reshape(tb, tm, tn).astype(recon_ref.dtype)

    # Per-block partial squared error; final sum + sqrt happens in the wrapper,
    # so every grid axis stays "parallel" (megacore / dual-TC friendly).
    diff = recon - v_ref[...].reshape(tb * tm, tn).astype(jnp.float32)
    if total_t % tb != 0:
        # Ragged last time block: out-of-bounds rows hold unspecified data;
        # zero them out of the loss (their recon rows are dropped by Pallas's
        # masked writeback of the partial output block).
        t0 = pl.program_id(0) * tb
        row_t = lax.broadcasted_iota(jnp.int32, (tb * tm, 1), 0) // tm + t0
        diff = jnp.where(row_t < total_t, diff, 0.0)
    sq = jnp.sum(diff * diff)
    # Aligned (1, 8, 128) lane-dense store; wrapper reads [:, 0, 0].
    psum_ref[...] = jnp.full((1, 8, 128), sq, dtype=jnp.float32)


def _vmem_limit_bytes():
    """Generation-aware scoped-VMEM limit (leave real headroom under physical)."""
    try:
        phys = getattr(pltpu.get_tpu_info(), "vmem_capacity_bytes", None)
    except Exception:
        phys = None
    if not phys:
        phys = 64 << 20  # conservative: v7x has 64 MiB per TensorCore
    # ~75% of physical, capped: ~96 MiB on v5e/v6e (128 MiB), ~48 MiB on v7x.
    return int(max(32 << 20, min(phys * 3 // 4, 96 << 20)))


def _pick_vocab_tile(dv, target, align):
    """Largest divisor of dv that is a multiple of `align` and <= target (or dv)."""
    if dv <= target:
        return dv
    for c in range(target, align - 1, -align):
        if dv % c == 0:
            return c
    return dv  # no aligned divisor; fall back to the full (untiled) dim


def _pick_time_block(T, Tm, Tn, Dk, vmem_limit_bytes):
    """Pick Tb: fit corrected VMEM model, target ~8 MiB/step, keep steps to pipeline."""
    dkp = _round_up(Dk, 128)   # W's minor (topic) dim is lane-padded to 128 in VMEM
    tnp = _round_up(Tn, 128)
    tmp = _round_up(Tm, 8)
    # Double-buffered pipeline blocks (W + V + recon), f32 bytes per time slice.
    per_t_blocks = 2 * 4 * (tmp * dkp + 2 * tmp * tnp)
    # f32 in-kernel intermediates (pre-cast recon + diff), single-buffered.
    per_t_interm = 2 * 4 * Tm * Tn
    per_t = per_t_blocks + per_t_interm
    budget = max(per_t, vmem_limit_bytes - (4 << 20))  # headroom: H bufs, psum, spill
    cap_vmem = max(1, budget // per_t)
    # Target ~8 MiB of HBM traffic per grid step (near-roofline tiles, amortizes
    # the ~0.35 us fixed per-step cost)...
    per_t_hbm = 4 * (Tm * Dk + 2 * Tm * Tn)
    cap_hbm = max(1, (8 << 20) // per_t_hbm)
    tb = max(1, min(T, cap_vmem, cap_hbm))
    # ...but keep several grid steps when T allows so the BlockSpec pipeline has
    # iterations to overlap and v7x can split the time axis over both TCs.
    min_tb = max(1, (2 << 20) // per_t_hbm)   # don't shrink steps below ~2 MiB
    tb_4steps = max(1, -(-T // 4))
    if tb_4steps >= min_tb:
        tb = min(tb, tb_4steps)
    elif T > 1:
        tb = min(tb, -(-T // 2))              # at least 2 steps (v7x dual-TC)
    # Prefer a Tb that divides T (avoids a ragged last block) if one is close.
    for d in range(tb, max(1, (2 * tb) // 3) - 1, -1):
        if T % d == 0:
            return d
    return tb


def tnmf_forward(W, H, V):
    """W: (T, Dv, Dk), H: (1, Dk, Dv), V: (T, Dv, Dv) -> (M_recon (T,Dv,Dv), loss scalar)."""
    T, Dv, Dk = W.shape
    assert H.shape == (1, Dk, Dv)
    assert V.shape == (T, Dv, Dv)

    vmem_limit = _vmem_limit_bytes()
    Tm = _pick_vocab_tile(Dv, 256, 8)     # sublane tile of recon/V/W rows
    Tn = _pick_vocab_tile(Dv, 512, 128)   # lane tile of recon/V/H (lane-dense stores)
    Tb = _pick_time_block(T, Tm, Tn, Dk, vmem_limit)

    nb = -(-T // Tb)
    nm = Dv // Tm
    nn = Dv // Tn
    nblk = nb * nm * nn

    kernel = functools.partial(_tnmf_forward_kernel, total_t=T)

    recon, psums = pl.pallas_call(
        kernel,
        out_shape=(
            jax.ShapeDtypeStruct((T, Dv, Dv), W.dtype),        # exact shape: no pad/slice copies
            jax.ShapeDtypeStruct((nblk, 8, 128), jnp.float32),  # per-block sq-err partials
        ),
        grid_spec=pltpu.PrefetchScalarGridSpec(
            num_scalar_prefetch=0,
            grid=(nb, nm, nn),
            in_specs=[
                pl.BlockSpec((Tb, Tm, Dk), lambda t, m, n: (t, m, 0)),   # W block
                pl.BlockSpec((1, Dk, Tn), lambda t, m, n: (0, 0, n)),    # H (broadcast over time/rows)
                pl.BlockSpec((Tb, Tm, Tn), lambda t, m, n: (t, m, n)),   # V block
            ],
            out_specs=(
                pl.BlockSpec((Tb, Tm, Tn), lambda t, m, n: (t, m, n)),   # M_recon block
                pl.BlockSpec((1, 8, 128),
                             lambda t, m, n: (t * (nm * nn) + m * nn + n, 0, 0)),
            ),
        ),
        compiler_params=pltpu.CompilerParams(
            dimension_semantics=("parallel", "parallel", "parallel"),
            vmem_limit_bytes=vmem_limit,
        ),
    )(W, H, V)

    loss = jnp.sqrt(jnp.sum(psums[:, 0, 0]))
    return recon, loss


def init_tnmf_params(key, dim_vocab, dim_topic, dim_time, M):
    """Deterministic re-implementation of TNMF.__init__ parameter construction in JAX."""
    kh, kw = jax.random.split(key)
    scaling_factor = jnp.sqrt(M.mean(axis=(-1, -2)) / dim_topic)  # (T,)
    H = jax.random.uniform(kh, (1, dim_topic, dim_vocab), jnp.float32, 0.0, 2.0)
    H = H * scaling_factor.mean()
    W = jax.random.uniform(kw, (dim_time, dim_vocab, dim_topic), jnp.float32, 0.0, 2.0)
    W = W * scaling_factor.reshape(-1, 1, 1)
    glob = jnp.sqrt(M.mean() / dim_topic)
    H = H * glob
    W = W * glob
    return W.astype(M.dtype), H.astype(M.dtype)


def reference_forward(W, H, V):
    recon = jnp.einsum("tvk,bkw->tvw", W, H)  # batched matmul with broadcast over time
    loss = jnp.sqrt(jnp.sum((recon - V) ** 2))
    return recon, loss


if __name__ == "__main__":
    dim_vocab, dim_topic, dim_time = 128, 16, 4

    key = jax.random.PRNGKey(0)
    k_m, k_p = jax.random.split(key)

    # Synthetic nonnegative co-occurrence tensor M = V, shape (time, vocab, vocab)
    M = jax.random.uniform(k_m, (dim_time, dim_vocab, dim_vocab), jnp.float32, 0.0, 1.0)

    W, H = init_tnmf_params(k_p, dim_vocab, dim_topic, dim_time, M)

    recon, loss = tnmf_forward(W, H, M)
    jax.block_until_ready((recon, loss))

    recon_ref, loss_ref = reference_forward(W, H, M)
    assert recon.shape == recon_ref.shape
    assert jnp.allclose(recon, recon_ref, rtol=1e-5, atol=1e-5), "reconstruction mismatch"
    assert jnp.allclose(loss, loss_ref, rtol=1e-5, atol=1e-5), "loss mismatch"

    print("KERNEL_OK")
</pallas_src>

<mosaic_0001>
module attributes {stable_mosaic.version = 11 : i64} {
  func.func @_tnmf_forward_kernel(%arg0: i32, %arg1: i32, %arg2: i32, %arg3: memref<2x128x16xf32, #tpu.memory_space<vmem>>, %arg4: memref<1x16x128xf32, #tpu.memory_space<vmem>>, %arg5: memref<2x128x128xf32, #tpu.memory_space<vmem>>, %arg6: memref<2x128x128xf32, #tpu.memory_space<vmem>>, %arg7: memref<1x8x128xf32, #tpu.memory_space<vmem>>) attributes {dimension_semantics = [#tpu.dimension_semantics<parallel>, #tpu.dimension_semantics<parallel>, #tpu.dimension_semantics<parallel>], iteration_bounds = array<i64: 2, 1, 1>, scalar_prefetch = 0 : i64, scratch_operands = 0 : i64, tpu.core_type = #tpu.core_type<tc>, window_params = [{transform_indices = @transform_0, window_bounds = array<i64: 2, 128, 16>}, {transform_indices = @transform_1, window_bounds = array<i64: 1, 16, 128>}, {transform_indices = @transform_2, window_bounds = array<i64: 2, 128, 128>}, {transform_indices = @transform_3, window_bounds = array<i64: 2, 128, 128>}, {transform_indices = @transform_4, window_bounds = array<i64: 1, 8, 128>}]} {
    %c0 = arith.constant 0 : index
    %c0_0 = arith.constant 0 : index
    %c0_1 = arith.constant 0 : index
    %0 = vector.load %arg3[%c0, %c0_0, %c0_1] : memref<2x128x16xf32, #tpu.memory_space<vmem>>, vector<2x128x16xf32>
    %1 = vector.shape_cast %0 : vector<2x128x16xf32> to vector<256x16xf32>
    %c0_2 = arith.constant 0 : index
    %c0_3 = arith.constant 0 : index
    %c0_4 = arith.constant 0 : index
    %2 = vector.load %arg4[%c0_2, %c0_3, %c0_4] : memref<1x16x128xf32, #tpu.memory_space<vmem>>, vector<1x16x128xf32>
    %3 = vector.shape_cast %2 : vector<1x16x128xf32> to vector<16x128xf32>
    %cst = arith.constant dense<0.000000e+00> : vector<256x128xf32>
    %4 = tpu.matmul %1, %3, %cst {dimension_numbers = #tpu.dot_dimension_numbers<[1], [0], [0], [1], [0, 0, 1, 1], [], []>} : vector<256x16xf32>, vector<16x128xf32>, vector<256x128xf32> -> vector<256x128xf32>
    %5 = vector.shape_cast %4 : vector<256x128xf32> to vector<2x128x128xf32>
    %c0_5 = arith.constant 0 : index
    %c0_6 = arith.constant 0 : index
    %c0_7 = arith.constant 0 : index
    %6 = vector.load %arg6[%c0_5, %c0_6, %c0_7] : memref<2x128x128xf32, #tpu.memory_space<vmem>>, vector<2x128x128xf32>
    tpu.vector_store %arg6[%c0_5, %c0_6, %c0_7], %5 {strides = array<i32>} : memref<2x128x128xf32, #tpu.memory_space<vmem>>, vector<2x128x128xf32>,
    %c0_8 = arith.constant 0 : index
    %c0_9 = arith.constant 0 : index
    %c0_10 = arith.constant 0 : index
    %7 = vector.load %arg5[%c0_8, %c0_9, %c0_10] : memref<2x128x128xf32, #tpu.memory_space<vmem>>, vector<2x128x128xf32>
    %8 = vector.shape_cast %7 : vector<2x128x128xf32> to vector<256x128xf32>
    %9 = arith.subf %4, %8 : vector<256x128xf32>
    %10 = arith.mulf %9, %9 : vector<256x128xf32>
    %11 = vector.shape_cast %10 : vector<256x128xf32> to vector<1x256x128xf32>
    %cst_11 = arith.constant dense<0.000000e+00> : vector<1xf32>
    %12 = vector.multi_reduction <add>, %11, %cst_11 [1, 2] : vector<1x256x128xf32> to vector<1xf32>
    %13 = vector.shape_cast %12 : vector<1xf32> to vector<1x1x1xf32>
    %14 = vector.extract %13[0, 0, 0] : f32 from vector<1x1x1xf32>
    %15 = vector.broadcast %14 : f32 to vector<1x8x128xf32>
    %c0_12 = arith.constant 0 : index
    %c0_13 = arith.constant 0 : index
    %c0_14 = arith.constant 0 : index
    %16 = vector.load %arg7[%c0_12, %c0_13, %c0_14] : memref<1x8x128xf32, #tpu.memory_space<vmem>>, vector<1x8x128xf32>
    tpu.vector_store %arg7[%c0_12, %c0_13, %c0_14], %15 {strides = array<i32>} : memref<1x8x128xf32, #tpu.memory_space<vmem>>, vector<1x8x128xf32>,
    return
  }
  func.func @transform_0(%arg0: i32, %arg1: i32, %arg2: i32) -> (i32, i32, i32) {
    %c0_i32 = arith.constant 0 : i32
    %c0_i32_0 = arith.constant 0 : i32
    return %arg0, %arg1, %c0_i32 : i32, i32, i32
  }
  func.func @transform_1(%arg0: i32, %arg1: i32, %arg2: i32) -> (i32, i32, i32) {
    %c0_i32 = arith.constant 0 : i32
    %c0_i32_0 = arith.constant 0 : i32
    %c0_i32_1 = arith.constant 0 : i32
    return %c0_i32, %c0_i32_0, %arg2 : i32, i32, i32
  }
  func.func @transform_2(%arg0: i32, %arg1: i32, %arg2: i32) -> (i32, i32, i32) {
    %c0_i32 = arith.constant 0 : i32
    return %arg0, %arg1, %arg2 : i32, i32, i32
  }
  func.func @transform_3(%arg0: i32, %arg1: i32, %arg2: i32) -> (i32, i32, i32) {
    %c0_i32 = arith.constant 0 : i32
    return %arg0, %arg1, %arg2 : i32, i32, i32
  }
  func.func @transform_4(%arg0: i32, %arg1: i32, %arg2: i32) -> (i32, i32, i32) {
    %c1_i32 = arith.constant 1 : i32
    %0 = arith.muli %arg0, %c1_i32 : i32
    %c1_i32_0 = arith.constant 1 : i32
    %1 = arith.muli %arg1, %c1_i32_0 : i32
    %2 = arith.addi %0, %1 : i32
    %3 = arith.addi %2, %arg2 : i32
    %c0_i32 = arith.constant 0 : i32
    %c0_i32_1 = arith.constant 0 : i32
    %c0_i32_2 = arith.constant 0 : i32
    return %3, %c0_i32, %c0_i32_1 : i32, i32, i32
  }
}

</mosaic_0001>

<bundles_post_ra>
// kernel: tpu_custom_call.1
= control target key start
LH: loop header
LB: loop body
LE: loop exit
PB: predicated region body
PF: predicated region fallthrough
CT: control target
= control target key end

     0   :  { %10 = vsyncpa [#allocation3], 0  ;;  %s1737_s0 = inlined_call_operand.vmem [shape: f32[4,128,16], index: 0, kind: input, shape index: {}]   ;;  %s1738_s1 = inlined_call_operand.vmem [shape: f32[1,16,128], index: 1, kind: input, shape index: {}]   ;;  %s1739_s2 = inlined_call_operand.vmem [shape: f32[4,128,128], index: 2, kind: input, shape index: {}]   ;;  %s1740_s3 = inlined_call_operand.hbm [shape: f32[4,128,128], index: 3, kind: output, shape index: {0}]   ;;  %s1741_s4 = inlined_call_operand.hbm [shape: f32[2,8,128], index: 4, kind: output, shape index: {1}]  }
   0x1   :  { %12 = vsyncpa [#allocation3 + $0x1], 0 }
   0x2   :  { %13 = vsyncpa [#allocation5], 0 }
   0x3   :  { %15 = vsyncpa [#allocation5 + $0x1], 0  ;;  %s1394_s15 = smov 0   ;;  %s1396_s16 = smov 0  }
   0x4   :  { %s1398_s17 = smov 0   ;;  %s1400_s18 = smov 0  }
   0x5   :  { %s1402_s19 = smov 0   ;;  %s1404_s20 = smov 0  }
   0x6 LB: > { %s1045_s21 = sadd.s32 4294967295, %s1363_s20   ;;  %s1046_s22 = sadd.s32 4294967294, %s1363_s20   ;;  %s1363_s20 = sphi %s1404_s20, %s21_s20   ;;  %s1359_s19 = sphi %s1402_s19, %s1748_s19   ;;  %s1355_s18 = sphi %s1400_s18, %s1747_s18   ;;  %s1351_s17 = sphi %s1398_s17, %s1746_s17   ;;  %s1347_s16 = sphi %s1396_s16, %s1745_s16   ;;  %s1343_s15 = sphi %s1394_s15, %s1744_s15  }
   0x7   : > { %s40_s23 = sadd.s32 1, %s1359_s19  ;;  %s135_s24 = sadd.s32 1, %s1351_s17 }
   0x8   : > { %p42_p0 = scmp.ge.s32.totalorder %s40_s23, 2  ;;  %p145_p1 = scmp.ne.s32.totalorder %s1351_s17, %s1347_s16 }
   0x9   : > { %p146_p2 = scmp.eq.s32.totalorder %s1045_s21, 1  ;;  %p151_p3 = scmp.ne.s32.totalorder %s1347_s16, %s1343_s15 }
   0xa   : > { %s1750_s23 = smov (%p42_p0, %s40_s23), 0  ;;  %p152_p5 = scmp.eq.s32.totalorder %s1046_s22, 1 }
   0xb   : > { %p1434_p4 = por %p146_p2, %p145_p1  ;;  %s128_s26 = ssub.s32 %s1359_s19, %s1750_s23 }
   0xc   : > { %p1050_p6 = scmp.ge.s32.totalorder %s1363_s20, 1  ;;  %p133_p7 = scmp.eq.s32.totalorder %s128_s26, 0 }
   0xd   : > { %p1441_p8 = por %p152_p5, %p151_p3  ;;  %p240_p9 = scmp.lt.s32.totalorder %s1363_s20, 3 }
   0xe   : > { %s1447_s28 = scalar_select %p133_p7, %s1351_s17, %s135_s24  }
   0xf   : > { %p241_p10 = pnand %p1050_p6, %p240_p9 }
  0x10   : > { %s1053_s7 = sshll.u32 (!%p241_p10), %s1355_s18, 1  ;;  %s1531_s12 = sand.u32 (!%p241_p10), 1, %s1347_s16  }
  0x11   : > { %244 = sbr.rel (%p241_p10) target bundleno = 505 (0x1f9), region = 32  ;;  %p295_p11 = scmp.lt.s32.totalorder (!%p241_p10), %s1053_s7, 3 }
  0x12   : > { %s1051_s13 = sshll.u32 (!%p241_p10), %s1531_s12, 8  ;;  %s1102_s26 = sshll.u32 (!%p241_p10), %s1355_s18, 12 }
  0x13   : > { %s1543_s24 = scalar_lea.vmem (!%p241_p10), [#allocation2], %s1051_s13  ;;  %s1663_s5 = scalar_lea.hbm (!%p241_p10), %s1740_s3, %s1102_s26 }
  0x14   : > { %s877_s6 = sshll.u32 (!%p241_p10), %s1543_s24, 4  ;;  %s1365_s9 = smov (!%p241_p10), [#allocation2]   ;;  %s1666_s6 = int_to_ptr.vmem [resolvable:$true] %s877_s6 }
  0x15   : > { %s1261_s10 = sshll.u32 (!%p241_p10), %s1365_s9, 4  ;;  %s1262_s10 = int_to_ptr.vmem [resolvable:$false] %s1261_s10 }
  0x16   : > { %v361_v0 = vld [vmem:[%s1738_s1 + $0x8] sm:$0xff]  ;;  %v360_v1 = vld [vmem:[%s1738_s1] sm:$0xff]  ;;  %s1752_s7 = smov (!%p295_p11, %s1053_s7), 3  ;;  %vm362_vm0 = vcmask 130048   ;;  %p1264_p1 = scmp.lt.s32.totalorder %s1666_s6, %s1262_s10 }
  0x17   : > { %1137 = vmatprep.subr.mxu0 %v361_v0  ;;  %1189 = vmatprep.subr.mxu1 %v361_v0  ;;  %s1099_s8 = sshll.u32 %s1752_s7, 7  ;;  %s855_s7 = scalar_lea.sflag [#allocation3], %s1531_s12 }
  0x18   : > { %1138 = vmatpush3.msra.mxu0 %v361_v0  ;;  %1191 = vmatpush3.msra.mxu1 %v361_v0  ;;  %s1464_s11 = scalar_lea.vmem %s1737_s0, %s1099_s8  ;;  %s1539_s22 = scalar_lea.vmem %s1739_s2, %s1099_s8 }
  0x19   : > { %1139 = vmatprep.subr.mxu0 %v360_v1  ;;  %1190 = vmatprep.subr.mxu1 %v360_v1  ;;  %v328_v2 = vld [vmem:[%s1464_s11] sm:$0xff]  ;;  %v329_v3 = vld [vmem:[%s1464_s11 + $0x8] sm:$0xff]  ;;  %v330_v4 = vld [vmem:[%s1464_s11 + $0x10] sm:$0xff]  ;;  %s1257_s8 = scalar_lea.vmem %s1666_s6, 4096 }
  0x1a   : > { %1140 = vmatpush3.msra.mxu0 %v360_v1  ;;  %1192 = vmatpush3.msra.mxu1 %v360_v1  ;;  %v331_v5 = vld [vmem:[%s1464_s11 + $0x18] sm:$0xff]  ;;  %v332_v6 = vld [vmem:[%s1464_s11 + $0x20] sm:$0xff]  ;;  %v345_v8 = vld [vmem:[%s1464_s11 + $0x88] sm:$0xff]  ;;  %p1258_p12 = scmp.ne.s32.totalorder %s1666_s6, %s1257_s8 }
  0x1b   : > { %1141 = vmatprep.mubr.msk.f32.mxu0 %vm362_vm0, %v328_v2  ;;  %v344_v7 = vld [vmem:[%s1464_s11 + $0x80] sm:$0xff]  ;;  %v346_v9 = vld [vmem:[%s1464_s11 + $0x90] sm:$0xff]  ;;  %v333_v10 = vld [vmem:[%s1464_s11 + $0x28] sm:$0xff] }
  0x1c   : > { %1142 = vmatmul.mubr.msk.f32.vlgmr.msra.gmra.mxu0 %vm362_vm0, %v329_v3  ;;  %1165 = vmatprep.mubr.msk.f32.mxu1 %vm362_vm0, %v344_v7  ;;  %v334_v11 = vld [vmem:[%s1464_s11 + $0x30] sm:$0xff]  ;;  %v347_v12 = vld [vmem:[%s1464_s11 + $0x98] sm:$0xff]  ;;  %v348_v13 = vld [vmem:[%s1464_s11 + $0xa0] sm:$0xff]  ;;  %p1259_p13 = pnand %p1258_p12, %p1434_p4 }
  0x1d   : > { %1144 = vmatprep.mubr.msk.f32.mxu0 %vm362_vm0, %v330_v4  ;;  %1166 = vmatmul.mubr.msk.f32.vlgmr.msra.gmra.mxu1 %vm362_vm0, %v345_v8  ;;  %v335_v14 = vld [vmem:[%s1464_s11 + $0x38] sm:$0xff]  ;;  %v336_v15 = vld [vmem:[%s1464_s11 + $0x40] sm:$0xff]  ;;  %v349_v16 = vld [vmem:[%s1464_s11 + $0xa8] sm:$0xff] }
  0x1e   : > { %1168 = vmatprep.mubr.msk.f32.mxu1 %vm362_vm0, %v346_v9  ;;  %v350_v17 = vld [vmem:[%s1464_s11 + $0xb0] sm:$0xff]  ;;  %v337_v18 = vld [vmem:[%s1464_s11 + $0x48] sm:$0xff]  ;;  %v351_v20 = vld [vmem:[%s1464_s11 + $0xb8] sm:$0xff]  ;;  %p1260_p0 = pneg %p1259_p13 }
  0x1f   : > { %v338_v19 = vld [vmem:[%s1464_s11 + $0x50] sm:$0xff]  ;;  %v352_v21 = vld [vmem:[%s1464_s11 + $0xc0] sm:$0xff]  ;;  %v339_v22 = vld [vmem:[%s1464_s11 + $0x58] sm:$0xff] }
  0x20   : > { %1145 = vmatmul.mubr.msk.f32.gmra.mxu0 %vm362_vm0, %v331_v5  ;;  %v340_v23 = vld [vmem:[%s1464_s11 + $0x60] sm:$0xff]  ;;  %v353_v24 = vld [vmem:[%s1464_s11 + $0xc8] sm:$0xff]  ;;  %v354_v25 = vld [vmem:[%s1464_s11 + $0xd0] sm:$0xff] }
  0x21   : > { %1147 = vmatprep.mubr.msk.f32.mxu0 %vm362_vm0, %v332_v6  ;;  %1169 = vmatmul.mubr.msk.f32.gmra.mxu1 %vm362_vm0, %v347_v12  ;;  %v341_v26 = vld [vmem:[%s1464_s11 + $0x68] sm:$0xff]  ;;  %v342_v27 = vld [vmem:[%s1464_s11 + $0x70] sm:$0xff]  ;;  %v355_v28 = vld [vmem:[%s1464_s11 + $0xd8] sm:$0xff] }
  0x22   : > { %1171 = vmatprep.mubr.msk.f32.mxu1 %vm362_vm0, %v348_v13  ;;  %v356_v29 = vld [vmem:[%s1464_s11 + $0xe0] sm:$0xff]  ;;  %v343_v30 = vld [vmem:[%s1464_s11 + $0x78] sm:$0xff]  ;;  %v357_v31 = vld [vmem:[%s1464_s11 + $0xe8] sm:$0xff] }
  0x23   : > { %v358_v32 = vld [vmem:[%s1464_s11 + $0xf0] sm:$0xff]  ;;  %v359_v33 = vld [vmem:[%s1464_s11 + $0xf8] sm:$0xff]  ;;  %v717_v35 = vld [vmem:[%s1539_s22 + $0x8] sm:$0xff]  ;;  %s1263_s11 = scalar_lea.vmem %s1262_s10, 8192 }
  0x24   : > { %1148 = vmatmul.mubr.msk.f32.gmra.mxu0 %vm362_vm0, %v333_v10  ;;  %v716_v36 = vld [vmem:[%s1539_s22] sm:$0xff]  ;;  %v719_v41 = vld [vmem:[%s1539_s22 + $0x18] sm:$0xff]  ;;  %v718_v42 = vld [vmem:[%s1539_s22 + $0x10] sm:$0xff]  ;;  %p1265_p2 = scmp.lt.s32.totalorder %s1263_s11, %s1257_s8 }
  0x25   : > { %1150 = vmatprep.mubr.msk.f32.mxu0 %vm362_vm0, %v334_v11  ;;  %1172 = vmatmul.mubr.msk.f32.gmra.mxu1 %vm362_vm0, %v349_v16  ;;  %v721_v51 = vld [vmem:[%s1539_s22 + $0x28] sm:$0xff]  ;;  %v720_v52 = vld [vmem:[%s1539_s22 + $0x20] sm:$0xff]  ;;  %v723_v63 = vld [vmem:[%s1539_s22 + $0x38] sm:$0xff] }
  0x26   : > { %1174 = vmatprep.mubr.msk.f32.mxu1 %vm362_vm0, %v350_v17  ;;  %v722_v0 = vld [vmem:[%s1539_s22 + $0x30] sm:$0xff]  ;;  %v725_v11 = vld [vmem:[%s1539_s22 + $0x48] sm:$0xff]  ;;  %v724_v12 = vld [vmem:[%s1539_s22 + $0x40] sm:$0xff]  ;;  %p1266_p3 = por %p1265_p2, %p1264_p1 }
  0x28   : > { %1151 = vmatmul.mubr.msk.f32.gmra.mxu0 %vm362_vm0, %v335_v14  ;;  %p1267_p5 = pnand %p1266_p3, %p1260_p0 }
  0x29   : > { %1153 = vmatprep.mubr.msk.f32.mxu0 %vm362_vm0, %v336_v15  ;;  %1175 = vmatmul.mubr.msk.f32.gmra.mxu1 %vm362_vm0, %v351_v20 }
  0x2a   : > { %1177 = vmatprep.mubr.msk.f32.mxu1 %vm362_vm0, %v352_v21 }
  0x2c   : > { %1154 = vmatmul.mubr.msk.f32.gmra.mxu0 %vm362_vm0, %v337_v18 }
  0x2d   : > { %1156 = vmatprep.mubr.msk.f32.mxu0 %vm362_vm0, %v338_v19  ;;  %1178 = vmatmul.mubr.msk.f32.gmra.mxu1 %vm362_vm0, %v353_v24  ;;  %v726_v24 = vld [vmem:[%s1539_s22 + $0x50] sm:$0xff] }
  0x2e   : > { %1180 = vmatprep.mubr.msk.f32.mxu1 %vm362_vm0, %v354_v25 }
  0x30   : > { %1157 = vmatmul.mubr.msk.f32.gmra.mxu0 %vm362_vm0, %v339_v22 }
  0x31   : > { %1159 = vmatprep.mubr.msk.f32.mxu0 %vm362_vm0, %v340_v23  ;;  %1181 = vmatmul.mubr.msk.f32.gmra.mxu1 %vm362_vm0, %v355_v28  ;;  %v727_v23 = vld [vmem:[%s1539_s22 + $0x58] sm:$0xff] }
  0x32   : > { %1183 = vmatprep.mubr.msk.f32.mxu1 %vm362_vm0, %v356_v29 }
  0x34   : > { %1160 = vmatmul.mubr.msk.f32.gmra.mxu0 %vm362_vm0, %v341_v26 }
  0x35   : > { %1162 = vmatprep.mubr.msk.f32.mxu0 %vm362_vm0, %v342_v27  ;;  %1184 = vmatmul.mubr.msk.f32.gmra.mxu1 %vm362_vm0, %v357_v31 }
  0x36   : > { %1186 = vmatprep.mubr.msk.f32.mxu1 %vm362_vm0, %v358_v32 }
  0x38   : > { %1163 = vmatmul.mubr.msk.f32.gmra.mxu0 %vm362_vm0, %v343_v30 }
  0x39   : > { %1187 = vmatmul.mubr.msk.f32.gmra.mxu1 %vm362_vm0, %v359_v33 }
  0xdc   : > { %v1143_v34 = vpop.f32.mrf.mxu0 }
  0xdd   : > { %685 = vst [vmem:[%s1543_s24 + $0x8] sm:$0xff] %v1143_v34  ;;  %v749_v38 = vsub.f32 %v1143_v34, %v717_v35  ;;  %v1550_v44 = vpop.f32.mrf.mxu1  ;;  %v729_v35 = vld [vmem:[%s1539_s22 + $0x68] sm:$0xff] }
  0xde   : > { %v525_v37 = vpop.f32.mrf.mxu0  ;;  %701 = vst [vmem:[%s1543_s24 + $0x88] sm:$0xff] %v1550_v44 }
  0xdf   : > { %684 = vst [vmem:[%s1543_s24] sm:$0xff] %v525_v37  ;;  %v748_v39 = vsub.f32 %v525_v37, %v716_v36  ;;  %v781_v46 = vmul.f32 %v749_v38, %v749_v38  ;;  %v1555_v49 = vpop.f32.mrf.mxu1  ;;  %v728_v36 = vld [vmem:[%s1539_s22 + $0x60] sm:$0xff] }
  0xe0   : > { %v1146_v40 = vpop.f32.mrf.mxu0  ;;  %700 = vst [vmem:[%s1543_s24 + $0x80] sm:$0xff] %v1555_v49 }
  0xe1   : > { %v780_v43 = vmul.f32 %v748_v39, %v748_v39  ;;  %687 = vst [vmem:[%s1543_s24 + $0x18] sm:$0xff] %v1146_v40  ;;  %v751_v47 = vsub.f32 %v1146_v40, %v719_v41  ;;  %v1562_v55 = vpop.f32.mrf.mxu1 }
  0xe2   : > { %v535_v45 = vpop.f32.mrf.mxu0  ;;  %703 = vst [vmem:[%s1543_s24 + $0x98] sm:$0xff] %v1562_v55 }
  0xe3   : > { %686 = vst [vmem:[%s1543_s24 + $0x10] sm:$0xff] %v535_v45  ;;  %v750_v48 = vsub.f32 %v535_v45, %v718_v42  ;;  %v812_v53 = vadd.f32 %v781_v46, %v780_v43  ;;  %v783_v57 = vmul.f32 %v751_v47, %v751_v47  ;;  %v1567_v61 = vpop.f32.mrf.mxu1 }
  0xe4   : > { %v1149_v50 = vpop.f32.mrf.mxu0  ;;  %702 = vst [vmem:[%s1543_s24 + $0x90] sm:$0xff] %v1567_v61 }
  0xe5   : > { %v782_v54 = vmul.f32 %v750_v48, %v750_v48  ;;  %689 = vst [vmem:[%s1543_s24 + $0x28] sm:$0xff] %v1149_v50  ;;  %v753_v59 = vsub.f32 %v1149_v50, %v721_v51  ;;  %v1574_v3 = vpop.f32.mrf.mxu1  ;;  %v731_v48 = vld [vmem:[%s1539_s22 + $0x78] sm:$0xff]  ;;  %v730_v50 = vld [vmem:[%s1539_s22 + $0x70] sm:$0xff] }
  0xe6   : > { %v545_v56 = vpop.f32.mrf.mxu0  ;;  %705 = vst [vmem:[%s1543_s24 + $0xa8] sm:$0xff] %v1574_v3 }
  0xe7   : > { %v813_v58 = vadd.f32 %v812_v53, %v782_v54  ;;  %688 = vst [vmem:[%s1543_s24 + $0x20] sm:$0xff] %v545_v56  ;;  %v752_v60 = vsub.f32 %v545_v56, %v720_v52  ;;  %v785_v5 = vmul.f32 %v753_v59, %v753_v59  ;;  %v1579_v9 = vpop.f32.mrf.mxu1  ;;  %v732_v56 = vld [vmem:[%s1539_s22 + $0x80] sm:$0xff] }
  0xe8   : > { %v1152_v62 = vpop.f32.mrf.mxu0  ;;  %704 = vst [vmem:[%s1543_s24 + $0xa0] sm:$0xff] %v1579_v9 }
  0xe9   : > { %v784_v1 = vmul.f32 %v752_v60, %v752_v60  ;;  %v814_v2 = vadd.f32 %v813_v58, %v783_v57  ;;  %691 = vst [vmem:[%s1543_s24 + $0x38] sm:$0xff] %v1152_v62  ;;  %v755_v7 = vsub.f32 %v1152_v62, %v723_v63  ;;  %v1586_v15 = vpop.f32.mrf.mxu1  ;;  %v733_v63 = vld [vmem:[%s1539_s22 + $0x88] sm:$0xff] }
  0xea   : > { %v555_v4 = vpop.f32.mrf.mxu0  ;;  %707 = vst [vmem:[%s1543_s24 + $0xb8] sm:$0xff] %v1586_v15 }
  0xeb   : > { %v815_v6 = vadd.f32 %v814_v2, %v784_v1  ;;  %690 = vst [vmem:[%s1543_s24 + $0x30] sm:$0xff] %v555_v4  ;;  %v754_v8 = vsub.f32 %v555_v4, %v722_v0  ;;  %v787_v17 = vmul.f32 %v755_v7, %v755_v7  ;;  %v1591_v21 = vpop.f32.mrf.mxu1  ;;  %v764_v2 = vsub.f32 %v1555_v49, %v732_v56  ;;  %v746_v56 = vld [vmem:[%s1539_s22 + $0xf0] sm:$0xff] }
  0xec   : > { %v1155_v10 = vpop.f32.mrf.mxu0  ;;  %706 = vst [vmem:[%s1543_s24 + $0xb0] sm:$0xff] %v1591_v21 }
  0xed   : > { %v786_v13 = vmul.f32 %v754_v8, %v754_v8  ;;  %v816_v14 = vadd.f32 %v815_v6, %v785_v5  ;;  %693 = vst [vmem:[%s1543_s24 + $0x48] sm:$0xff] %v1155_v10  ;;  %v757_v19 = vsub.f32 %v1155_v10, %v725_v11  ;;  %v1598_v27 = vpop.f32.mrf.mxu1  ;;  %v734_v5 = vld [vmem:[%s1539_s22 + $0x90] sm:$0xff]  ;;  %v765_v8 = vsub.f32 %v1550_v44, %v733_v63  ;;  %v735_v11 = vld [vmem:[%s1539_s22 + $0x98] sm:$0xff] }
  0xee   : > { %v565_v16 = vpop.f32.mrf.mxu0  ;;  %709 = vst [vmem:[%s1543_s24 + $0xc8] sm:$0xff] %v1598_v27 }
  0xef   : > { %v817_v18 = vadd.f32 %v816_v14, %v786_v13  ;;  %692 = vst [vmem:[%s1543_s24 + $0x40] sm:$0xff] %v565_v16  ;;  %v756_v20 = vsub.f32 %v565_v16, %v724_v12  ;;  %v789_v29 = vmul.f32 %v757_v19, %v757_v19  ;;  %v1603_v33 = vpop.f32.mrf.mxu1  ;;  %v796_v13 = vmul.f32 %v764_v2, %v764_v2  ;;  %v736_v16 = vld [vmem:[%s1539_s22 + $0xa0] sm:$0xff]  ;;  %v737_v19 = vld [vmem:[%s1539_s22 + $0xa8] sm:$0xff] }
  0xf0   : > { %v1158_v22 = vpop.f32.mrf.mxu0  ;;  %708 = vst [vmem:[%s1543_s24 + $0xc0] sm:$0xff] %v1603_v33  ;;  %v766_v14 = vsub.f32 %v1567_v61, %v734_v5  ;;  %v797_v49 = vmul.f32 %v765_v8, %v765_v8  ;;  %v768_v44 = vsub.f32 %v1579_v9, %v736_v16 }
  0xf1   : > { %v788_v25 = vmul.f32 %v756_v20, %v756_v20  ;;  %v818_v26 = vadd.f32 %v817_v18, %v787_v17  ;;  %695 = vst [vmem:[%s1543_s24 + $0x58] sm:$0xff] %v1158_v22  ;;  %v759_v31 = vsub.f32 %v1158_v22, %v727_v23  ;;  %v1610_v39 = vpop.f32.mrf.mxu1  ;;  %v767_v18 = vsub.f32 %v1562_v55, %v735_v11  ;;  %v738_v23 = vld [vmem:[%s1539_s22 + $0xb0] sm:$0xff] }
  0xf2   : > { %v575_v28 = vpop.f32.mrf.mxu0  ;;  %711 = vst [vmem:[%s1543_s24 + $0xd8] sm:$0xff] %v1610_v39  ;;  %v798_v20 = vmul.f32 %v766_v14, %v766_v14  ;;  %v800_v61 = vmul.f32 %v768_v44, %v768_v44 }
  0xf3   : > { %v819_v30 = vadd.f32 %v818_v26, %v788_v25  ;;  %694 = vst [vmem:[%s1543_s24 + $0x50] sm:$0xff] %v575_v28  ;;  %v758_v32 = vsub.f32 %v575_v28, %v726_v24  ;;  %v791_v41 = vmul.f32 %v759_v31, %v759_v31  ;;  %v1615_v46 = vpop.f32.mrf.mxu1  ;;  %v799_v24 = vmul.f32 %v767_v18, %v767_v18  ;;  %v739_v28 = vld [vmem:[%s1539_s22 + $0xb8] sm:$0xff]  ;;  %v740_v31 = vld [vmem:[%s1539_s22 + $0xc0] sm:$0xff] }
  0xf4   : > { %v1161_v34 = vpop.f32.mrf.mxu0  ;;  %710 = vst [vmem:[%s1543_s24 + $0xd0] sm:$0xff] %v1615_v46  ;;  %v769_v26 = vsub.f32 %v1574_v3, %v737_v19 }
  0xf5   : > { %v790_v37 = vmul.f32 %v758_v32, %v758_v32  ;;  %v820_v38 = vadd.f32 %v819_v30, %v789_v29  ;;  %697 = vst [vmem:[%s1543_s24 + $0x68] sm:$0xff] %v1161_v34  ;;  %v761_v43 = vsub.f32 %v1161_v34, %v729_v35  ;;  %v1622_v53 = vpop.f32.mrf.mxu1  ;;  %v770_v30 = vsub.f32 %v1591_v21, %v738_v23  ;;  %v741_v35 = vld [vmem:[%s1539_s22 + $0xc8] sm:$0xff] }
  0xf6   : > { %v585_v40 = vpop.f32.mrf.mxu0  ;;  %713 = vst [vmem:[%s1543_s24 + $0xe8] sm:$0xff] %v1622_v53  ;;  %v801_v55 = vmul.f32 %v769_v26, %v769_v26  ;;  %v771_v34 = vsub.f32 %v1586_v15, %v739_v28 }
  0xf7   : > { %v821_v42 = vadd.f32 %v820_v38, %v790_v37  ;;  %696 = vst [vmem:[%s1543_s24 + $0x60] sm:$0xff] %v585_v40  ;;  %v760_v45 = vsub.f32 %v585_v40, %v728_v36  ;;  %v793_v57 = vmul.f32 %v761_v43, %v761_v43  ;;  %v665_v62 = vpop.f32.mrf.mxu1  ;;  %v802_v9 = vmul.f32 %v770_v30, %v770_v30  ;;  %v742_v38 = vld [vmem:[%s1539_s22 + $0xd0] sm:$0xff] }
  0xf8   : > { %v1164_v47 = vpop.f32.mrf.mxu0  ;;  %712 = vst [vmem:[%s1543_s24 + $0xe0] sm:$0xff] %v665_v62  ;;  %v772_v37 = vsub.f32 %v1603_v33, %v740_v31  ;;  %v803_v3 = vmul.f32 %v771_v34, %v771_v34 }
  0xf9   : > { %v792_v51 = vmul.f32 %v760_v45, %v760_v45  ;;  %v822_v52 = vadd.f32 %v821_v42, %v791_v41  ;;  %699 = vst [vmem:[%s1543_s24 + $0x78] sm:$0xff] %v1164_v47  ;;  %v763_v59 = vsub.f32 %v1164_v47, %v731_v48  ;;  %v1188_v4 = vpop.f32.mrf.mxu1  ;;  %v773_v41 = vsub.f32 %v1598_v27, %v741_v35  ;;  %v743_v42 = vld [vmem:[%s1539_s22 + $0xd8] sm:$0xff]  ;;  %v744_v47 = vld [vmem:[%s1539_s22 + $0xe0] sm:$0xff] }
  0xfa   : > { %v595_v54 = vpop.f32.mrf.mxu0  ;;  %715 = vst [vmem:[%s1543_s24 + $0xf8] sm:$0xff] %v1188_v4  ;;  %v804_v21 = vmul.f32 %v772_v37, %v772_v37  ;;  %v774_v45 = vsub.f32 %v1615_v46, %v742_v38 }
  0xfb   : > { %v823_v58 = vadd.f32 %v822_v52, %v792_v51  ;;  %698 = vst [vmem:[%s1543_s24 + $0x70] sm:$0xff] %v595_v54  ;;  %v762_v60 = vsub.f32 %v595_v54, %v730_v50  ;;  %v795_v6 = vmul.f32 %v763_v59, %v763_v59  ;;  %v675_v10 = vpop.f32.mrf.mxu1  ;;  %v805_v15 = vmul.f32 %v773_v41, %v773_v41  ;;  %v745_v51 = vld [vmem:[%s1539_s22 + $0xe8] sm:$0xff]  ;;  %v747_v59 = vld [vmem:[%s1539_s22 + $0xf8] sm:$0xff] }
  0xfc   : > { %714 = vst [vmem:[%s1543_s24 + $0xf0] sm:$0xff] %v675_v10  ;;  %v775_v50 = vsub.f32 %v1610_v39, %v743_v42  ;;  %v806_v52 = vmul.f32 %v774_v45, %v774_v45  ;;  %v776_v54 = vsub.f32 %v665_v62, %v744_v47  ;;  %v777_v27 = vsub.f32 %v1622_v53, %v745_v51 }
  0xfd   : > { %v794_v0 = vmul.f32 %v762_v60, %v762_v60  ;;  %v824_v1 = vadd.f32 %v823_v58, %v793_v57  ;;  %v778_v63 = vsub.f32 %v675_v10, %v746_v56  ;;  %v779_v39 = vsub.f32 %v1188_v4, %v747_v59 }
  0xfe   : > { %v807_v57 = vmul.f32 %v775_v50, %v775_v50  ;;  %v808_v60 = vmul.f32 %v776_v54, %v776_v54 }
  0xff   : > { %v825_v7 = vadd.f32 %v824_v1, %v794_v0  ;;  %v809_v0 = vmul.f32 %v777_v27, %v777_v27  ;;  %v810_v2 = vmul.f32 %v778_v63, %v778_v63 }
 0x101   : > { %v826_v12 = vadd.f32 %v825_v7, %v795_v6  ;;  %v811_v6 = vmul.f32 %v779_v39, %v779_v39 }
 0x103   : > { %v827_v17 = vadd.f32 %v826_v12, %v796_v13 }
 0x105   : > { %v828_v22 = vadd.f32 %v827_v17, %v797_v49 }
 0x107   : > { %v829_v25 = vadd.f32 %v828_v22, %v798_v20 }
 0x109   : > { %v830_v29 = vadd.f32 %v829_v25, %v799_v24 }
 0x10b   : > { %v831_v32 = vadd.f32 %v830_v29, %v800_v61 }
 0x10d   : > { %v832_v36 = vadd.f32 %v831_v32, %v801_v55 }
 0x10f   : > { %v833_v40 = vadd.f32 %v832_v36, %v802_v9 }
 0x111   : > { %v834_v43 = vadd.f32 %v833_v40, %v803_v3 }
 0x113   : > { %v835_v48 = vadd.f32 %v834_v43, %v804_v21 }
 0x115   : > { %v836_v33 = vadd.f32 %v835_v48, %v805_v15 }
 0x117   : > { %v837_v58 = vadd.f32 %v836_v33, %v806_v52 }
 0x119   : > { %v838_v46 = vadd.f32 %v837_v58, %v807_v57 }
 0x11b   : > { %v839_v1 = vadd.f32 %v838_v46, %v808_v60 }
 0x11d   : > { %v840_v5 = vadd.f32 %v839_v1, %v809_v0 }
 0x11f   : > { %v841_v62 = vadd.f32 %v840_v5, %v810_v2 }
 0x121   : > { %v842_v7 = vadd.f32 %v841_v62, %v811_v6 }
 0x123   : > { %843 = vadd.xlane.f32.xlu0 %v842_v7 }
 0x124   : > { %1270 = shalt.err (!%p1267_p5)
}
 0x125   : > { %s1271_s13 = scalar_lea.hbm %s1663_s5, 4096  ;;  %s1275_s22 = scalar_lea.hbm %s1740_s3, 8192 }
 0x126   : > { %p1272_p6 = scmp.ne.s32.totalorder %s1663_s5, %s1271_s13  ;;  %p1276_p10 = scmp.lt.s32.totalorder %s1663_s5, %s1740_s3 }
 0x127   : > { %p1277_p11 = scmp.lt.s32.totalorder %s1275_s22, %s1271_s13 }
 0x128   : > { %p1273_p7 = pnand %p1272_p6, %p1434_p4 }
 0x129   : > { %p1278_p12 = por %p1277_p11, %p1276_p10 }
 0x12a   : > { %p1274_p9 = pneg %p1273_p7 }
 0x12c   : > { %p1279_p13 = pnand %p1278_p12, %p1274_p9 }
 0x12e   : > { %1282 = shalt.err (!%p1279_p13)
}
 0x12f   : > { %s1366_s29 = smov 128   ;;  %s1367_s30 = smov 8  }
 0x130   : > { %1195 = dma.vmem_to_hbm [thread:$0]  (%p1434_p4), %s1666_s6, 4096, %s1663_s5, %s855_s7, %s1366_s29, %s1366_s29, %s1367_s30  }
 0x131   : > { %s1052_s8 = sshll.u32 %s1531_s12, 3  ;;  %s1096_s11 = sshll.u32 %s1355_s18, 7 }
 0x132   : > { %s292_s9 = scalar_lea.vmem [#allocation4], %s1052_s8  ;;  %s893_s13 = scalar_lea.hbm %s1741_s4, %s1096_s11 }
 0x133   : > { %s895_s10 = sshll.u32 %s292_s9, 4  ;;  %s860_s14 = scalar_lea.sflag [#allocation5], %s1531_s12  ;;  %s1693_s10 = int_to_ptr.vmem [resolvable:$true] %s895_s10 }
 0x134   : > { %s1283_s21 = scalar_lea.vmem %s1693_s10, 128  ;;  %s1368_s22 = smov [#allocation4]  }
 0x135   : > { %p1284_p0 = scmp.ne.s32.totalorder %s1693_s10, %s1283_s21  ;;  %s1287_s18 = sshll.u32 %s1368_s22, 4  ;;  %s1288_s18 = int_to_ptr.vmem [resolvable:$false] %s1287_s18 }
 0x136   : > { %s1289_s24 = scalar_lea.vmem %s1288_s18, 256  ;;  %p1290_p3 = scmp.lt.s32.totalorder %s1693_s10, %s1288_s18 }
 0x137   : > { %p1285_p1 = pnand %p1284_p0, %p1434_p4  ;;  %p1291_p5 = scmp.lt.s32.totalorder %s1289_s24, %s1283_s21 }
 0x139   : > { %p1286_p2 = pneg %p1285_p1  ;;  %p1292_p6 = por %p1291_p5, %p1290_p3 }
 0x13b   : > { %p1293_p7 = pnand %p1292_p6, %p1286_p2 }
 0x1ac   : > { %v844_v53 = vpop.xlane.xlu0 %843 }
 0x1ad   : > { %v845_v4 = vrot.slane %v844_v53, 4 }
 0x1af   : > { %v846_v8 = vadd.f32 %v845_v4, %v844_v53 }
 0x1b1   : > { %v847_v10 = vrot.slane %v846_v8, 2 }
 0x1b3   : > { %v848_v11 = vadd.f32 %v847_v10, %v846_v8 }
 0x1b5   : > { %v849_v12 = vrot.slane %v848_v11, 1 }
 0x1b7   : > { %v850_v13 = vadd.f32 %v849_v12, %v848_v11 }
 0x1b9   : > { %1193 = vpush %v850_v13 }
 0x1ea   : > { %s1194_s5 = spop %1193 }
 0x1eb   : > { %v852_v14 = vstv %s1194_s5 }
 0x1ec   : > { %853 = vst [vmem:[%s292_s9] sm:$0xff] %v852_v14 }
 0x1ed   : > { %1296 = shalt.err (!%p1293_p7)
}
 0x1ee   : > { %s1297_s26 = scalar_lea.hbm %s893_s13, 128  ;;  %s1301_s30 = scalar_lea.hbm %s1741_s4, 256 }
 0x1ef   : > { %p1298_p9 = scmp.ne.s32.totalorder %s893_s13, %s1297_s26  ;;  %p1302_p12 = scmp.lt.s32.totalorder %s893_s13, %s1741_s4 }
 0x1f0   : > { %p1303_p13 = scmp.lt.s32.totalorder %s1301_s30, %s1297_s26 }
 0x1f1   : > { %p1299_p10 = pnand %p1298_p9, %p1434_p4 }
 0x1f2   : > { %p1304_p0 = por %p1303_p13, %p1302_p12 }
 0x1f3   : > { %p1300_p11 = pneg %p1299_p10 }
 0x1f5   : > { %p1305_p1 = pnand %p1304_p0, %p1300_p11 }
 0x1f7   : > { %1308 = shalt.err (!%p1305_p1)
}
 0x1f8   : > { %1196 = dma.vmem_to_hbm [thread:$0]  (%p1434_p4), %s1693_s10, 128, %s893_s13, %s860_s14  }
 0x1f9 PF: > { %p1206_p2 = scmp.ge.s32.totalorder %s1363_s20, 2  ;;  %s907_s11 = sand.u32 1, %s1343_s15  }
 0x1fa   : > { %s908_s5 = scalar_lea.sflag [#allocation3], %s907_s11 }
 0x1fb   : > { %p1200_p3 = pnand %p1206_p2, %p1441_p8 }
 0x1fd   : > { %p1201_p5 = pneg %p1200_p3 }
 0x1ff   : > { %1334 = dma.done.wait (%p1201_p5), %s908_s5, 4096  }
 0x200   : > { %1336 = vsyncadd (%p1201_p5), %s908_s5, 4294963200  ;;  %s917_s6 = scalar_lea.sflag [#allocation5], %s907_s11 }
 0x201   : > { %1338 = dma.done.wait (%p1201_p5), %s917_s6, 128  }
 0x202   : > { %1340 = vsyncadd (%p1201_p5), %s917_s6, 4294967168  ;;  %s21_s20 = sadd.s32 1, %s1363_s20   ;;  %s1744_s15 = smov %s1347_s16 }
 0x203   : > { %p18_p6 = scmp.ge.s32.totalorder %s21_s20, 4   ;;  %s1745_s16 = smov %s1351_s17 }
 0x204   : > { %s1746_s17 = smov %s1447_s28  ;;  %s1747_s18 = smov %s1359_s19 }
 0x205   : > { %s1748_s19 = smov %s1750_s23  ;;  %20 = sbr.rel (!%p18_p6) target bundleno = 6 (0x6), region = 90 }
 0x20a   :  { %922 = vsyncpa [#allocation3], 1 }
 0x20b   :  { %924 = vsyncpa [#allocation3 + $0x1], 1 }
 0x20c   :  { %925 = vsyncpa [#allocation5], 1 }
 0x20d   :  { %927 = vsyncpa [#allocation5 + $0x1], 1 }

</bundles_post_ra>
